<compile_context>
chip_gen: v6e
topology: v6e:2x2x1
jax: 0.10.0
libtpu: 0.0.40
codegen_flags: <defaults>
</compile_context>

<pallas_src>
import numpy as np
import jax
import jax.numpy as jnp
from jax.experimental import pallas as pl
from jax.experimental.pallas import tpu as pltpu

N = 64        # number of graph nodes
C_IN = 16     # args.in_channels
H = 32        # args.hidden_channels1
E = 128       # directed random edges (made undirected -> 2E)
VROWS = 16    # rows reserved for the bias/head vector block (sublane-tile aligned)


# ----------------------------- Pallas kernel -------------------------------
def net_kernel(x_ref, a2_ref, const_ref, out_ref):
    f32 = jnp.float32
    bf16 = jnp.bfloat16

    def mm(a, b):
        return jnp.dot(a, b, preferred_element_type=f32)

    A2 = a2_ref[...]                                  # (2N, N) bf16 = [A_sage; A_gcn]
    w1 = const_ref[0:H, :]                            # (H, 4H)
    w2 = const_ref[H:3 * H, :]                        # (2H, 4H)
    w3 = const_ref[3 * H:5 * H, :]                    # (2H, 4H)
    vec = const_ref[5 * H:5 * H + VROWS, :].astype(f32)   # (16, 128) biases / heads

    # fc1 + relu (dropout is identity in eval mode); x is zero-padded to H lanes
    # so only the fc1_pad columns of w1 contribute.
    m0 = mm(x_ref[...], w1)                           # (N, 4H); lanes [0,H) valid
    out_1 = jnp.maximum(m0[:, 0:H] + vec[0:1, 0:H], 0.0)           # (N, H) f32
    x0x0 = jnp.concatenate([out_1, out_1], axis=1)                 # (N, 2H) residual

    # ---- block 1: one packed weight matmul + ONE stacked-operator matmul ----
    # NOTE: columns [0,H) of m1 (out_1 @ fc1_pad) are wasted MXU lanes, not a bug.
    m1 = mm(out_1.astype(bf16), w1)                   # cols: [junk | t1 | d1 | u1]
    big1 = mm(A2, m1.astype(bf16))                    # rows 0:N = As@m1, N:2N = Ag@m1
    out_2 = (jnp.concatenate([big1[0:N, H:2 * H] + m1[:, 2 * H:3 * H],
                              big1[N:2 * N, 3 * H:4 * H]], axis=1)
             + x0x0 + vec[1:2, 0:2 * H])              # = cat(out_c_1, out_aux_c_1)

    # ---- blocks 2 & 3: packed weights with a folded head column --------------
    def block(h, wpack, bias_row):
        m = mm(h.astype(bf16), wpack)                 # cols: [t | d | u | head | 0]
        big = mm(A2, m.astype(bf16))                  # rows 0:N = As@m, N:2N = Ag@m
        out = (jnp.concatenate([big[0:N, 0:H] + m[:, H:2 * H],
                                big[N:2 * N, 2 * H:3 * H]], axis=1)
               + x0x0 + bias_row)
        return out, m[:, 3 * H:3 * H + 1]             # (N, 2H), (N, 1) head column

    out_3, head2 = block(out_2, w2, vec[2:3, 0:2 * H])
    out_3 = out_3 + out_2                             # + x1 residual
    out_4, head3 = block(out_3, w3, vec[3:4, 0:2 * H])
    out_4 = out_4 + out_2                             # + x1 residual

    # ---- heads: ensemble scalars w1..w4 folded; out_2/out_3 heads already on MXU
    res = (jnp.sum(out_1 * vec[4:5, 0:H], axis=-1, keepdims=True)
           + head2 + head3
           + jnp.sum(out_4 * vec[5:6, 0:2 * H], axis=-1, keepdims=True)
           + vec[0:1, 127:128])                       # folded total head bias
    out_ref[...] = res


# ------------------------------- wrapper ------------------------------------
_VMEM = pl.BlockSpec(memory_space=pltpu.MemorySpace.VMEM)

_net_call = pl.pallas_call(
    net_kernel,
    out_shape=jax.ShapeDtypeStruct((N, 1), jnp.float32),
    in_specs=[_VMEM] * 3,
    out_specs=_VMEM,
)


@jax.jit
def net_forward(x_pad, a2, const):
    """x_pad: (N, H) bf16 padded features; a2/const come from pack_* helpers."""
    return _net_call(x_pad, a2, const)


def pad_features(x):
    """(N, C_IN) -> (N, H) bf16 with zero lanes C_IN..H (one-time, off hot path)."""
    xp = jnp.zeros((N, H), jnp.float32).at[:, :C_IN].set(jnp.asarray(x, jnp.float32))
    return xp.astype(jnp.bfloat16)


def pack_operators(a_sage, a_gcn):
    """Stack the two graph operators into one (2N, N) bf16 slab -> one DMA."""
    return jnp.concatenate([a_sage, a_gcn], axis=0).astype(jnp.bfloat16)


def pack_params(p):
    """One-time host-side packing of ALL params into a single (176, 128) bf16 slab."""
    f32 = jnp.float32

    def t(w):                       # [out, in] -> [in, out]
        return jnp.asarray(w, f32).T

    we = [jnp.asarray(p[k], f32).reshape(()) for k in ("w1", "w2", "w3", "w4")]

    # --- w1 slab (H, 4H): [fc1 (zero-padded to H rows) | s1_wl | s1_wr | g1_w]
    fc1_pad = jnp.zeros((H, H), f32).at[:C_IN, :].set(t(p["fc1_w"]))
    w1s = jnp.concatenate([fc1_pad, t(p["s1_wl"]), t(p["s1_wr"]), t(p["g1_w"])], axis=1)

    # --- w2/w3 slabs (2H, 4H): [s_wl | s_wr | g_w | folded-head column | zeros]
    def wpack(wl, wr, wg, hv):
        s = jnp.zeros((2 * H, 4 * H), f32)
        s = s.at[:, 0:H].set(t(wl))
        s = s.at[:, H:2 * H].set(t(wr))
        s = s.at[:, 2 * H:3 * H].set(t(wg))
        s = s.at[:, 3 * H].set(hv)
        return s

    hv2 = we[1] * jnp.asarray(p["l2_w"], f32)[0]     # out_2 head, scalar folded
    hv3 = we[2] * jnp.asarray(p["l3_w"], f32)[0]     # out_3 head, scalar folded
    w2s = wpack(p["s2_wl"], p["s2_wr"], p["g2_w"], hv2)
    w3s = wpack(p["s3_wl"], p["s3_wr"], p["g3_w"], hv3)

    # --- vector rows: biases + out_1/out_4 head vectors + folded total head bias
    b_total = (we[0] * jnp.asarray(p["l1_b"], f32)[0]
               + we[1] * jnp.asarray(p["l2_b"], f32)[0]
               + we[2] * jnp.asarray(p["l3_b"], f32)[0]
               + we[3] * jnp.asarray(p["l4_b"], f32)[0])

    vec = jnp.zeros((VROWS, 128), f32)
    vec = vec.at[0, 0:H].set(jnp.asarray(p["fc1_b"], f32))
    vec = vec.at[0, 127].set(b_total)
    vec = vec.at[1, 0:2 * H].set(
        jnp.concatenate([jnp.asarray(p["s1_bl"], f32), jnp.asarray(p["g1_b"], f32)]))
    vec = vec.at[2, 0:2 * H].set(
        jnp.concatenate([jnp.asarray(p["s2_bl"], f32), jnp.asarray(p["g2_b"], f32)]))
    vec = vec.at[3, 0:2 * H].set(
        jnp.concatenate([jnp.asarray(p["s3_bl"], f32), jnp.asarray(p["g3_b"], f32)]))
    vec = vec.at[4, 0:H].set(we[0] * jnp.asarray(p["l1_w"], f32)[0])
    vec = vec.at[5, 0:2 * H].set(we[3] * jnp.asarray(p["l4_w"], f32)[0])

    const = jnp.concatenate([w1s, w2s, w3s, vec], axis=0).astype(jnp.bfloat16)
    assert const.shape == (5 * H + VROWS, 128)
    return const


# --------------------------- graph construction -----------------------------
def random_edge_index(key, n, e):
    src = jax.random.randint(key, (e,), 0, n)
    tgt = jax.random.randint(jax.random.fold_in(key, 1), (e,), 0, n)
    # force undirected (like force_undirected=True)
    return jnp.stack([jnp.concatenate([src, tgt]), jnp.concatenate([tgt, src])])


def dense_adj(edge_index, n):
    a = jnp.zeros((n, n), jnp.float32)
    return a.at[edge_index[1], edge_index[0]].set(1.0)   # A[target, source]


def sage_operator(a):
    deg = a.sum(axis=1, keepdims=True)
    return jnp.where(deg > 0, a / jnp.where(deg > 0, deg, 1.0), 0.0)


def gcn_operator(a):
    a = a + jnp.eye(a.shape[0], dtype=a.dtype)
    deg = a.sum(axis=1)
    dinv = jnp.where(deg > 0, 1.0 / jnp.sqrt(deg), 0.0)
    return dinv[:, None] * a * dinv[None, :]


# ------------------------------ parameters -----------------------------------
def init_params(key):
    keys = jax.random.split(key, 32)
    k = iter(keys)

    def w(shape, scale=0.1):
        return jax.random.normal(next(k), shape, jnp.float32) * scale

    p = dict(
        fc1_w=w((H, C_IN)), fc1_b=w((H,)),
        s1_wl=w((H, H)), s1_bl=w((H,)), s1_wr=w((H, H)),
        s2_wl=w((H, 2 * H)), s2_bl=w((H,)), s2_wr=w((H, 2 * H)),
        s3_wl=w((H, 2 * H)), s3_bl=w((H,)), s3_wr=w((H, 2 * H)),
        g1_w=w((H, H)), g1_b=w((H,)),
        g2_w=w((H, 2 * H)), g2_b=w((H,)),
        g3_w=w((H, 2 * H)), g3_b=w((H,)),
        l1_w=w((1, H)), l1_b=w((1,)),
        l2_w=w((1, 2 * H)), l2_b=w((1,)),
        l3_w=w((1, 2 * H)), l3_b=w((1,)),
        l4_w=w((1, 2 * H)), l4_b=w((1,)),
        w1=0.99, w2=0.95, w3=0.3, w4=0.15,
    )
    return p


# ------------------------------ reference ------------------------------------
def reference(x, a_sage, a_gcn, p):
    hp = jax.lax.Precision.HIGHEST

    def lin(h, w, b):
        return jnp.dot(h, jnp.asarray(w).T, precision=hp) + jnp.asarray(b)

    def sage(h, wl, bl, wr):
        return (jnp.dot(jnp.dot(a_sage, h, precision=hp), jnp.asarray(wl).T, precision=hp)
                + jnp.asarray(bl) + jnp.dot(h, jnp.asarray(wr).T, precision=hp))

    def gcn(h, wt, b):
        return jnp.dot(a_gcn, jnp.dot(h, jnp.asarray(wt).T, precision=hp),
                       precision=hp) + jnp.asarray(b)

    out_1 = jax.nn.relu(lin(x, p["fc1_w"], p["fc1_b"]))
    x0 = out_1
    out_c_1 = sage(out_1, p["s1_wl"], p["s1_bl"], p["s1_wr"]) + x0
    out_aux_c_1 = gcn(out_1, p["g1_w"], p["g1_b"]) + x0
    out_2 = jnp.concatenate([out_c_1, out_aux_c_1], 1)
    x1 = out_2
    out_c_2 = sage(out_2, p["s2_wl"], p["s2_bl"], p["s2_wr"]) + x0
    out_aux_c_2 = gcn(out_2, p["g2_w"], p["g2_b"]) + x0
    out_3 = jnp.concatenate([out_c_2, out_aux_c_2], 1) + x1
    out_c_3 = sage(out_3, p["s3_wl"], p["s3_bl"], p["s3_wr"]) + x0
    out_aux_c_3 = gcn(out_3, p["g3_w"], p["g3_b"]) + x0
    out_4 = jnp.concatenate([out_c_3, out_aux_c_3], 1) + x1
    res1 = lin(out_1, p["l1_w"], p["l1_b"])
    res2 = lin(out_2, p["l2_w"], p["l2_b"])
    res3 = lin(out_3, p["l3_w"], p["l3_b"])
    res4 = lin(out_4, p["l4_w"], p["l4_b"])
    return res1 * p["w1"] + res2 * p["w2"] + res3 * p["w3"] + res4 * p["w4"]


# --------------------------------- main ---------------------------------------
if __name__ == "__main__":
    root = jax.random.PRNGKey(0)
    k_x, k_e, k_ea, k_p = jax.random.split(root, 4)

    x = jax.random.normal(k_x, (N, C_IN), jnp.float32)
    edge_index = random_edge_index(k_e, N, E)
    edge_index_aux = random_edge_index(k_ea, N, E)

    a_sage = sage_operator(dense_adj(edge_index, N))
    a_gcn = gcn_operator(dense_adj(edge_index_aux, N))

    params = init_params(k_p)

    # one-time packing / padding (hoisted out of the per-call path): 3 DMAs total
    const = jax.block_until_ready(pack_params(params))
    a2 = jax.block_until_ready(pack_operators(a_sage, a_gcn))
    x_pad = jax.block_until_ready(pad_features(x))

    out = net_forward(x_pad, a2, const)
    out = jax.block_until_ready(out)

    ref = jax.block_until_ready(reference(x, a_sage, a_gcn, params))
    assert out.shape == (N, 1)
    # NOTE: kernel uses bf16 MXU operands + reassociated SAGE + folded ensemble
    # scalars; rounding order differs from the HIGHEST-precision reference.
    np.testing.assert_allclose(np.asarray(out), np.asarray(ref), rtol=2e-2, atol=2e-2)

    print("KERNEL_OK")
</pallas_src>

<mosaic_0001>
module attributes {stable_mosaic.version = 11 : i64} {
  func.func @net_kernel(%arg0: memref<64x32xbf16, #tpu.memory_space<vmem>>, %arg1: memref<128x64xbf16, #tpu.memory_space<vmem>>, %arg2: memref<176x128xbf16, #tpu.memory_space<vmem>>, %arg3: memref<64x1xf32, #tpu.memory_space<vmem>>) attributes {dimension_semantics = [], scalar_prefetch = 0 : i64, scratch_operands = 0 : i64, tpu.core_type = #tpu.core_type<tc>} {
    %c0 = arith.constant 0 : index
    %c0_0 = arith.constant 0 : index
    %0 = vector.load %arg1[%c0, %c0_0] : memref<128x64xbf16, #tpu.memory_space<vmem>>, vector<128x64xbf16>
    %c0_1 = arith.constant 0 : index
    %c0_2 = arith.constant 0 : index
    %1 = vector.load %arg2[%c0_1, %c0_2] : memref<176x128xbf16, #tpu.memory_space<vmem>>, vector<32x128xbf16>
    %c32 = arith.constant 32 : index
    %c0_3 = arith.constant 0 : index
    %2 = vector.load %arg2[%c32, %c0_3] : memref<176x128xbf16, #tpu.memory_space<vmem>>, vector<64x128xbf16>
    %c96 = arith.constant 96 : index
    %c0_4 = arith.constant 0 : index
    %3 = vector.load %arg2[%c96, %c0_4] : memref<176x128xbf16, #tpu.memory_space<vmem>>, vector<64x128xbf16>
    %c160 = arith.constant 160 : index
    %c0_5 = arith.constant 0 : index
    %4 = vector.load %arg2[%c160, %c0_5] : memref<176x128xbf16, #tpu.memory_space<vmem>>, vector<16x128xbf16>
    %5 = arith.extf %4 : vector<16x128xbf16> to vector<16x128xf32>
    %c0_6 = arith.constant 0 : index
    %c0_7 = arith.constant 0 : index
    %6 = vector.load %arg0[%c0_6, %c0_7] : memref<64x32xbf16, #tpu.memory_space<vmem>>, vector<64x32xbf16>
    %cst = arith.constant dense<0.000000e+00> : vector<64x128xf32>
    %7 = tpu.matmul %6, %1, %cst {dimension_numbers = #tpu.dot_dimension_numbers<[1], [0], [0], [1], [0, 0, 1, 1], [], []>} : vector<64x32xbf16>, vector<32x128xbf16>, vector<64x128xf32> -> vector<64x128xf32>
    %8 = vector.extract_strided_slice %7 {offsets = [0, 0], sizes = [64, 32], strides = [1, 1]} : vector<64x128xf32> to vector<64x32xf32>
    %9 = vector.extract_strided_slice %5 {offsets = [0, 0], sizes = [1, 32], strides = [1, 1]} : vector<16x128xf32> to vector<1x32xf32>
    %10 = vector.broadcast %9 : vector<1x32xf32> to vector<64x32xf32>
    %11 = arith.addf %8, %10 : vector<64x32xf32>
    %cst_8 = arith.constant 0.000000e+00 : f32
    %12 = vector.broadcast %cst_8 : f32 to vector<64x32xf32>
    %13 = arith.maximumf %11, %12 : vector<64x32xf32>
    %14 = tpu.concatenate %13, %13 in 1 : vector<64x32xf32>, vector<64x32xf32> -> vector<64x64xf32>
    %15 = arith.truncf %13 : vector<64x32xf32> to vector<64x32xbf16>
    %cst_9 = arith.constant dense<0.000000e+00> : vector<64x128xf32>
    %16 = tpu.matmul %15, %1, %cst_9 {dimension_numbers = #tpu.dot_dimension_numbers<[1], [0], [0], [1], [0, 0, 1, 1], [], []>} : vector<64x32xbf16>, vector<32x128xbf16>, vector<64x128xf32> -> vector<64x128xf32>
    %17 = arith.truncf %16 : vector<64x128xf32> to vector<64x128xbf16>
    %cst_10 = arith.constant dense<0.000000e+00> : vector<128x128xf32>
    %18 = tpu.matmul %0, %17, %cst_10 {dimension_numbers = #tpu.dot_dimension_numbers<[1], [0], [0], [1], [0, 0, 1, 1], [], []>} : vector<128x64xbf16>, vector<64x128xbf16>, vector<128x128xf32> -> vector<128x128xf32>
    %19 = vector.extract_strided_slice %18 {offsets = [0, 32], sizes = [64, 32], strides = [1, 1]} : vector<128x128xf32> to vector<64x32xf32>
    %20 = vector.extract_strided_slice %16 {offsets = [0, 64], sizes = [64, 32], strides = [1, 1]} : vector<64x128xf32> to vector<64x32xf32>
    %21 = arith.addf %19, %20 : vector<64x32xf32>
    %22 = vector.extract_strided_slice %18 {offsets = [64, 96], sizes = [64, 32], strides = [1, 1]} : vector<128x128xf32> to vector<64x32xf32>
    %23 = tpu.concatenate %21, %22 in 1 : vector<64x32xf32>, vector<64x32xf32> -> vector<64x64xf32>
    %24 = arith.addf %23, %14 : vector<64x64xf32>
    %25 = vector.extract_strided_slice %5 {offsets = [1, 0], sizes = [1, 64], strides = [1, 1]} : vector<16x128xf32> to vector<1x64xf32>
    %26 = vector.broadcast %25 : vector<1x64xf32> to vector<64x64xf32>
    %27 = arith.addf %24, %26 : vector<64x64xf32>
    %28 = vector.extract_strided_slice %5 {offsets = [2, 0], sizes = [1, 64], strides = [1, 1]} : vector<16x128xf32> to vector<1x64xf32>
    %29 = arith.truncf %27 : vector<64x64xf32> to vector<64x64xbf16>
    %cst_11 = arith.constant dense<0.000000e+00> : vector<64x128xf32>
    %30 = tpu.matmul %29, %2, %cst_11 {dimension_numbers = #tpu.dot_dimension_numbers<[1], [0], [0], [1], [0, 0, 1, 1], [], []>} : vector<64x64xbf16>, vector<64x128xbf16>, vector<64x128xf32> -> vector<64x128xf32>
    %31 = arith.truncf %30 : vector<64x128xf32> to vector<64x128xbf16>
    %cst_12 = arith.constant dense<0.000000e+00> : vector<128x128xf32>
    %32 = tpu.matmul %0, %31, %cst_12 {dimension_numbers = #tpu.dot_dimension_numbers<[1], [0], [0], [1], [0, 0, 1, 1], [], []>} : vector<128x64xbf16>, vector<64x128xbf16>, vector<128x128xf32> -> vector<128x128xf32>
    %33 = vector.extract_strided_slice %32 {offsets = [0, 0], sizes = [64, 32], strides = [1, 1]} : vector<128x128xf32> to vector<64x32xf32>
    %34 = vector.extract_strided_slice %30 {offsets = [0, 32], sizes = [64, 32], strides = [1, 1]} : vector<64x128xf32> to vector<64x32xf32>
    %35 = arith.addf %33, %34 : vector<64x32xf32>
    %36 = vector.extract_strided_slice %32 {offsets = [64, 64], sizes = [64, 32], strides = [1, 1]} : vector<128x128xf32> to vector<64x32xf32>
    %37 = tpu.concatenate %35, %36 in 1 : vector<64x32xf32>, vector<64x32xf32> -> vector<64x64xf32>
    %38 = arith.addf %37, %14 : vector<64x64xf32>
    %39 = vector.broadcast %28 : vector<1x64xf32> to vector<64x64xf32>
    %40 = arith.addf %38, %39 : vector<64x64xf32>
    %41 = vector.extract_strided_slice %30 {offsets = [0, 96], sizes = [64, 1], strides = [1, 1]} : vector<64x128xf32> to vector<64x1xf32>
    %42 = arith.addf %40, %27 : vector<64x64xf32>
    %43 = vector.extract_strided_slice %5 {offsets = [3, 0], sizes = [1, 64], strides = [1, 1]} : vector<16x128xf32> to vector<1x64xf32>
    %44 = arith.truncf %42 : vector<64x64xf32> to vector<64x64xbf16>
    %cst_13 = arith.constant dense<0.000000e+00> : vector<64x128xf32>
    %45 = tpu.matmul %44, %3, %cst_13 {dimension_numbers = #tpu.dot_dimension_numbers<[1], [0], [0], [1], [0, 0, 1, 1], [], []>} : vector<64x64xbf16>, vector<64x128xbf16>, vector<64x128xf32> -> vector<64x128xf32>
    %46 = arith.truncf %45 : vector<64x128xf32> to vector<64x128xbf16>
    %cst_14 = arith.constant dense<0.000000e+00> : vector<128x128xf32>
    %47 = tpu.matmul %0, %46, %cst_14 {dimension_numbers = #tpu.dot_dimension_numbers<[1], [0], [0], [1], [0, 0, 1, 1], [], []>} : vector<128x64xbf16>, vector<64x128xbf16>, vector<128x128xf32> -> vector<128x128xf32>
    %48 = vector.extract_strided_slice %47 {offsets = [0, 0], sizes = [64, 32], strides = [1, 1]} : vector<128x128xf32> to vector<64x32xf32>
    %49 = vector.extract_strided_slice %45 {offsets = [0, 32], sizes = [64, 32], strides = [1, 1]} : vector<64x128xf32> to vector<64x32xf32>
    %50 = arith.addf %48, %49 : vector<64x32xf32>
    %51 = vector.extract_strided_slice %47 {offsets = [64, 64], sizes = [64, 32], strides = [1, 1]} : vector<128x128xf32> to vector<64x32xf32>
    %52 = tpu.concatenate %50, %51 in 1 : vector<64x32xf32>, vector<64x32xf32> -> vector<64x64xf32>
    %53 = arith.addf %52, %14 : vector<64x64xf32>
    %54 = vector.broadcast %43 : vector<1x64xf32> to vector<64x64xf32>
    %55 = arith.addf %53, %54 : vector<64x64xf32>
    %56 = vector.extract_strided_slice %45 {offsets = [0, 96], sizes = [64, 1], strides = [1, 1]} : vector<64x128xf32> to vector<64x1xf32>
    %57 = arith.addf %55, %27 : vector<64x64xf32>
    %58 = vector.extract_strided_slice %5 {offsets = [4, 0], sizes = [1, 32], strides = [1, 1]} : vector<16x128xf32> to vector<1x32xf32>
    %59 = vector.broadcast %58 : vector<1x32xf32> to vector<64x32xf32>
    %60 = arith.mulf %13, %59 : vector<64x32xf32>
    %cst_15 = arith.constant dense<0.000000e+00> : vector<64xf32>
    %61 = vector.multi_reduction <add>, %60, %cst_15 [1] : vector<64x32xf32> to vector<64xf32>
    %62 = vector.shape_cast %61 : vector<64xf32> to vector<64x1xf32>
    %63 = arith.addf %62, %41 : vector<64x1xf32>
    %64 = arith.addf %63, %56 : vector<64x1xf32>
    %65 = vector.extract_strided_slice %5 {offsets = [5, 0], sizes = [1, 64], strides = [1, 1]} : vector<16x128xf32> to vector<1x64xf32>
    %66 = vector.broadcast %65 : vector<1x64xf32> to vector<64x64xf32>
    %67 = arith.mulf %57, %66 : vector<64x64xf32>
    %cst_16 = arith.constant dense<0.000000e+00> : vector<64xf32>
    %68 = vector.multi_reduction <add>, %67, %cst_16 [1] : vector<64x64xf32> to vector<64xf32>
    %69 = vector.shape_cast %68 : vector<64xf32> to vector<64x1xf32>
    %70 = arith.addf %64, %69 : vector<64x1xf32>
    %71 = vector.extract_strided_slice %5 {offsets = [0, 127], sizes = [1, 1], strides = [1, 1]} : vector<16x128xf32> to vector<1x1xf32>
    %72 = vector.broadcast %71 : vector<1x1xf32> to vector<64x1xf32>
    %73 = arith.addf %70, %72 : vector<64x1xf32>
    %c0_17 = arith.constant 0 : index
    %c0_18 = arith.constant 0 : index
    %74 = vector.load %arg3[%c0_17, %c0_18] : memref<64x1xf32, #tpu.memory_space<vmem>>, vector<64x1xf32>
    tpu.vector_store %arg3[%c0_17, %c0_18], %73 {strides = array<i32>} : memref<64x1xf32, #tpu.memory_space<vmem>>, vector<64x1xf32>,
    return
  }
}

</mosaic_0001>

<bundles_post_ra>
// kernel: net_forward.1
= control target key start
LH: loop header
LB: loop body
LE: loop exit
PB: predicated region body
PF: predicated region fallthrough
CT: control target
= control target key end

     0   :  { %vm93_vm0 = vcmask 261120   ;;  %v171_v6 = vlaneseq  ;;  %vm356_vm1 = vcmask 523264   ;;  %s1679_s29 = smov 96   ;;  %s1680_s30 = smov 32   ;;  %vm1378_vm2 = vcmask 7168   ;;  %s2269_s2 = inlined_call_operand.vmem [shape: bf16[176,128], index: 2, kind: input, shape index: {}]   ;;  %s2270_s0 = inlined_call_operand.vmem [shape: bf16[64,32], index: 0, kind: input, shape index: {}]   ;;  %s2271_s1 = inlined_call_operand.vmem [shape: bf16[128,64], index: 1, kind: input, shape index: {}]   ;;  %s2272_s3 = inlined_call_operand.vmem [shape: f32[64,1], index: 3, kind: output, shape index: {}]  }
   0x1   :  { %v1657_v0 = vld [vmem:[%s2269_s2 + $0x8] sm:$0xff]   ;;  %v1658_v1 = vld [vmem:[%s2269_s2] sm:$0xff]   ;;  %v1661_v4 = vld [vmem:[%s2270_s0 + $0x10] sm:$0xff]  }
   0x2   :  { %1517 = vmatprep.subr.bf16.mxu0 %v1657_v0  ;;  %v1659_v2 = vld [vmem:[%s2270_s0] sm:$0xff]   ;;  %1529 = vmatprep.subr.bf16.mxu1 %v1657_v0  ;;  %v1660_v3 = vld [vmem:[%s2270_s0 + $0x8] sm:$0xff]   ;;  %v1662_v5 = vld [vmem:[%s2270_s0 + $0x18] sm:$0xff]   ;;  %v1725_v7 = vshrl.u32 %v171_v6, 7 }
   0x3   :  { %1518 = vmatpush3.bf16.msra.mxu0 %v1657_v0  ;;  %1530 = vmatpush3.bf16.msra.mxu1 %v1657_v0  ;;  %v51_v8 = vld [vmem:[%s2269_s2 + $0x50] sm:$0xf]  ;;  %v1775_v40 = vld [vmem:[%s2271_s1] sm:$0xff]   ;;  %v1807_v54 = vld [vmem:[%s2271_s1 + $0x8] sm:$0xff]  }
   0x4   :  { %1519 = vmatprep.subr.bf16.mxu0 %v1658_v1  ;;  %1521 = vmatprep.mubr.msk.bf16.mxu0 %vm93_vm0, %v1659_v2  ;;  %v1730_v9 = vunpack.c.l.bf16 %v51_v8  ;;  %v173_v10 = vsub.s32 0, %v1725_v7  ;;  %v1780_v41 = vld [vmem:[%s2271_s1 + $0x20] sm:$0xff]   ;;  %v1812_v55 = vld [vmem:[%s2271_s1 + $0x28] sm:$0xff]   ;;  %v1817_v56 = vld [vmem:[%s2271_s1 + $0x10] sm:$0xff]  }
   0x5   :  { %1531 = vmatprep.subr.bf16.mxu1 %v1658_v1  ;;  %v1822_v57 = vld [vmem:[%s2271_s1 + $0x30] sm:$0xff]   ;;  %v1841_v58 = vld [vmem:[%s2271_s1 + $0x18] sm:$0xff]   ;;  %v1671_v60 = vld [vmem:[%s2269_s2 + $0x28] sm:$0xff]  }
   0x6   :  { %v1734_v12 = vrot.slane %v1730_v9, %v173_v10  ;;  %v1846_v59 = vld [vmem:[%s2271_s1 + $0x38] sm:$0xff]   ;;  %v1672_v61 = vld [vmem:[%s2269_s2 + $0x20] sm:$0xff]   ;;  %s1681_s1 = smov 64  }
   0x7   :  { %1520 = vmatpush3.bf16.msra.mxu0 %v1658_v1  ;;  %1532 = vmatpush3.bf16.msra.mxu1 %v1658_v1 }
   0xa   :  { %1522 = vmatmul.mubr.msk.bf16.vlgmr.msra.gmra.mxu0 %vm93_vm0, %v1660_v3  ;;  %v1673_v3 = vld [vmem:[%s2269_s2 + $0x18] sm:$0xff]  }
   0xb   :  { %1525 = vmatprep.mubr.msk.bf16.mxu0 %vm93_vm0, %v1661_v4 }
  0x12   :  { %1526 = vmatmul.mubr.msk.bf16.gmra.mxu0 %vm93_vm0, %v1662_v5 }
  0x13   :  { %1549 = vmatprep.mubr.msk.bf16.mxu0 %vm356_vm1, %v1775_v40 }
  0xca   :  { %v1523_v11 = vpop.f32.mrf.mxu0 }
  0xcb   :  { %v177_v17 = vadd.f32 %v1523_v11, %v1734_v12  ;;  %v1674_v11 = vld [vmem:[%s2269_s2 + $0x10] sm:$0xff]  }
  0xcc   :  { %v140_v13 = vpop.f32.mrf.mxu0 }
  0xcd   :  { %v175_v15 = vadd.f32 %v1734_v12, %v140_v13  ;;  %v1746_v24 = vmax.f32 %v177_v17, 0.0 }
  0xce   :  { %v1524_v14 = vpop.f32.mrf.mxu0 }
  0xcf   :  { %v178_v16 = vadd.f32 %v1524_v14, %v1734_v12  ;;  %v1742_v22 = vmax.f32 %v175_v15, 0.0 }
  0xd0   :  { %v143_v18 = vpop.f32.mrf.mxu0 }
  0xd1   :  { %v176_v19 = vadd.f32 %v1734_v12, %v143_v18  ;;  %v1740_v20 = vmax.f32 %v178_v16, 0.0 }
  0xd2   :  { %v1527_v21 = vpop.f32.mrf.mxu0 }
  0xd3   :  { %v1744_v23 = vmax.f32 %v176_v19, 0.0  ;;  %v232_v28 = vpack.c.bf16 %v1740_v20, %v1746_v24  ;;  %v181_v31 = vadd.f32 %v1527_v21, %v1734_v12 }
  0xd4   :  { %v156_v25 = vpop.f32.mrf.mxu0 }
  0xd5   :  { %v231_v26 = vpack.c.bf16 %v1744_v23, %v1742_v22  ;;  %v179_v29 = vadd.f32 %v1734_v12, %v156_v25  ;;  %v1764_v37 = vmax.f32 %v181_v31, 0.0 }
  0xd6   :  { %v1528_v27 = vpop.f32.mrf.mxu0 }
  0xd7   :  { %v182_v30 = vadd.f32 %v1528_v27, %v1734_v12  ;;  %1533 = vmatprep.mubr.msk.bf16.mxu1 %vm93_vm0, %v231_v26  ;;  %v1760_v35 = vmax.f32 %v179_v29, 0.0 }
  0xd8   :  { %v159_v32 = vpop.f32.mrf.mxu0  ;;  %1534 = vmatmul.mubr.msk.bf16.vlgmr.msra.gmra.mxu1 %vm93_vm0, %v232_v28 }
  0xd9   :  { %v180_v33 = vadd.f32 %v1734_v12, %v159_v32  ;;  %v1758_v34 = vmax.f32 %v182_v30, 0.0 }
  0xdb   :  { %v1762_v36 = vmax.f32 %v180_v33, 0.0  ;;  %v234_v39 = vpack.c.bf16 %v1758_v34, %v1764_v37 }
  0xdd   :  { %v233_v38 = vpack.c.bf16 %v1762_v36, %v1760_v35 }
  0xdf   :  { %1537 = vmatprep.mubr.msk.bf16.mxu1 %vm93_vm0, %v233_v38 }
  0xe0   :  { %1538 = vmatmul.mubr.msk.bf16.gmra.mxu1 %vm93_vm0, %v234_v39 }
  0xe1   :  { %1557 = vmatprep.mubr.msk.bf16.mxu1 %vm356_vm1, %v1780_v41 }
 0x198   :  { %v1535_v42 = vpop.f32.mrf.mxu1 }
 0x199   :  { %490 = vrot.lane.b32.xlu1 %v1535_v42, %s1679_s29 }
 0x19a   :  { %v281_v43 = vpop.f32.mrf.mxu1 }
 0x19b   :  { %486 = vrot.lane.b32.xlu0 %v281_v43, %s1679_s29 }
 0x19c   :  { %v1536_v44 = vpop.f32.mrf.mxu1 }
 0x19d   :  { %492 = vrot.lane.b32.xlu1 %v1536_v44, %s1679_s29  ;;  %v313_v52 = vpack.c.bf16 %v1536_v44, %v1535_v42 }
 0x19e   :  { %v284_v45 = vpop.f32.mrf.mxu1 }
 0x19f   :  { %488 = vrot.lane.b32.xlu0 %v284_v45, %s1679_s29  ;;  %v312_v53 = vpack.c.bf16 %v284_v45, %v281_v43 }
 0x1a0   :  { %v1539_v46 = vpop.f32.mrf.mxu1 }
 0x1a2   :  { %v297_v47 = vpop.f32.mrf.mxu1 }
 0x1a3   :  { %494 = vrot.lane.b32.xlu0 %v297_v47, %s1679_s29 }
 0x1a4   :  { %v1540_v48 = vpop.f32.mrf.mxu1 }
 0x1a5   :  { %v315_v49 = vpack.c.bf16 %v1540_v48, %v1539_v46 }
 0x1a6   :  { %v300_v50 = vpop.f32.mrf.mxu1 }
 0x1a7   :  { %v314_v51 = vpack.c.bf16 %v300_v50, %v297_v47  ;;  %498 = vrot.lane.b32.xlu0 %v1539_v46, %s1679_s29  ;;  %1541 = vmatprep.subr.bf16.mxu0 %v315_v49 }
 0x1a8   :  { %1645 = vmatprep.subr.bf16.mxu1 %v315_v49  ;;  %496 = vrot.lane.b32.xlu1 %v300_v50, %s1679_s29 }
 0x1a9   :  { %1542 = vmatpush3.bf16.msra.mxu0 %v315_v49  ;;  %1649 = vmatpush3.bf16.msra.mxu1 %v315_v49 }
 0x1aa   :  { %1543 = vmatprep.subr.bf16.mxu0 %v314_v51  ;;  %1646 = vmatprep.subr.bf16.mxu1 %v314_v51 }
 0x1ab   :  { %199 = vrot.lane.b32.xlu0 %v1742_v22, %s1680_s30 }
 0x1ac   :  { %500 = vrot.lane.b32.xlu1 %v1540_v48, %s1679_s29 }
 0x1ad   :  { %1544 = vmatpush3.bf16.msra.mxu0 %v314_v51  ;;  %1650 = vmatpush3.bf16.msra.mxu1 %v314_v51 }
 0x1ae   :  { %1545 = vmatprep.subr.bf16.mxu0 %v313_v52  ;;  %1647 = vmatprep.subr.bf16.mxu1 %v313_v52 }
 0x1af   :  { %203 = vrot.lane.b32.xlu0 %v1746_v24, %s1680_s30 }
 0x1b0   :  { %201 = vrot.lane.b32.xlu1 %v1744_v23, %s1680_s30 }
 0x1b1   :  { %1546 = vmatpush3.bf16.msra.mxu0 %v313_v52  ;;  %1651 = vmatpush3.bf16.msra.mxu1 %v313_v52 }
 0x1b2   :  { %1547 = vmatprep.subr.bf16.mxu0 %v312_v53  ;;  %1648 = vmatprep.subr.bf16.mxu1 %v312_v53 }
 0x1b3   :  { %207 = vrot.lane.b32.xlu0 %v1760_v35, %s1680_s30 }
 0x1b4   :  { %205 = vrot.lane.b32.xlu1 %v1740_v20, %s1680_s30 }
 0x1b5   :  { %1548 = vmatpush3.bf16.msra.mxu0 %v312_v53  ;;  %1652 = vmatpush3.bf16.msra.mxu1 %v312_v53 }
 0x1b6   :  { %1565 = vmatprep.subr.bf16.mxu1 %v1671_v60 }
 0x1b7   :  { %211 = vrot.lane.b32.xlu0 %v1764_v37, %s1680_s30 }
 0x1b8   :  { %209 = vrot.lane.b32.xlu1 %v1762_v36, %s1680_s30  ;;  %1550 = vmatmul.mubr.msk.bf16.vlgmr.msra.gmra.mxu0 %vm356_vm1, %v1807_v54 }
 0x1b9   :  { %1558 = vmatmul.mubr.msk.bf16.vlgmr.msra.gmra.mxu1 %vm356_vm1, %v1812_v55  ;;  %1553 = vmatprep.mubr.msk.bf16.mxu0 %vm356_vm1, %v1817_v56 }
 0x1ba   :  { %1561 = vmatprep.mubr.msk.bf16.mxu1 %vm356_vm1, %v1822_v57  ;;  %1566 = vmatpush3.bf16.msra.mxu1 %v1671_v60 }
 0x1bb   :  { %1567 = vmatprep.subr.bf16.mxu1 %v1672_v61 }
 0x1bc   :  { %213 = vrot.lane.b32.xlu1 %v1758_v34, %s1680_s30 }
 0x1be   :  { %1568 = vmatpush3.bf16.msra.mxu1 %v1672_v61 }
 0x1bf   :  { %1569 = vmatprep.subr.bf16.mxu1 %v1673_v3 }
 0x1c0   :  { %1554 = vmatmul.mubr.msk.bf16.gmra.mxu0 %vm356_vm1, %v1841_v58 }
 0x1c1   :  { %1562 = vmatmul.mubr.msk.bf16.gmra.mxu1 %vm356_vm1, %v1846_v59 }
 0x1c2   :  { %1570 = vmatpush3.bf16.msra.mxu1 %v1673_v3 }
 0x1c3   :  { %1571 = vmatprep.subr.bf16.mxu1 %v1674_v11 }
 0x1c6   :  { %1572 = vmatpush3.bf16.msra.mxu1 %v1674_v11 }
 0x20b   :  { %v491_v4 = vpop.permute.xlu1 %490 }
 0x20d   :  { %v487_v62 = vpop.permute.xlu0 %486 }
 0x20f   :  { %v493_v16 = vpop.permute.xlu1 %492 }
 0x211   :  { %v489_v8 = vpop.permute.xlu0 %488 }
 0x215   :  { %v495_v17 = vpop.permute.xlu0 %494 }
 0x219   :  { %v499_v30 = vpop.permute.xlu0 %498 }
 0x21a   :  { %v497_v26 = vpop.permute.xlu1 %496 }
 0x21d   :  { %v200_v45 = vpop.permute.xlu0 %199 }
 0x21e   :  { %v501_v38 = vpop.permute.xlu1 %500 }
 0x221   :  { %v204_v47 = vpop.permute.xlu0 %203 }
 0x222   :  { %v202_v46 = vpop.permute.xlu1 %201  ;;  %v1895_v11 = vsel %vm93_vm0, %v1746_v24, %v204_v47 }
 0x225   :  { %v208_v49 = vpop.permute.xlu0 %207 }
 0x226   :  { %v206_v48 = vpop.permute.xlu1 %205 }
 0x229   :  { %v212_v51 = vpop.permute.xlu0 %211 }
 0x22a   :  { %v210_v50 = vpop.permute.xlu1 %209 }
 0x22e   :  { %v214_v52 = vpop.permute.xlu1 %213 }
 0x278   :  { %v1551_v63 = vpop.f32.mrf.mxu0 }
 0x279   :  { %v1559_v0 = vpop.f32.mrf.mxu1  ;;  %v512_v13 = vadd.f32 %v1551_v63, %v491_v4 }
 0x27a   :  { %562 = vrot.lane.b32.xlu0 %v1559_v0, %s1681_s1  ;;  %v415_v1 = vpop.f32.mrf.mxu0 }
 0x27b   :  { %v447_v2 = vpop.f32.mrf.mxu1  ;;  %v510_v18 = vadd.f32 %v487_v62, %v415_v1 }
 0x27c   :  { %v1552_v5 = vpop.f32.mrf.mxu0 }
 0x27d   :  { %v1560_v6 = vpop.f32.mrf.mxu1  ;;  %v513_v19 = vadd.f32 %v1552_v5, %v493_v16  ;;  %v1885_v5 = vsel %vm93_vm0, %v1740_v20, %v206_v48  ;;  %v1900_v16 = vsel %vm93_vm0, %v1744_v23, %v202_v46  ;;  %v1928_v46 = vsel %vm93_vm0, %v1762_v36, %v210_v50 }
 0x27e   :  { %558 = vrot.lane.b32.xlu0 %v447_v2, %s1681_s1  ;;  %564 = vrot.lane.b32.xlu1 %v1560_v6, %s1681_s1  ;;  %v418_v14 = vpop.f32.mrf.mxu0  ;;  %v600_v2 = vsub.s32 1, %v1725_v7  ;;  %v1944_v50 = vsel %vm93_vm0, %v1758_v34, %v214_v52 }
 0x27f   :  { %v450_v10 = vpop.f32.mrf.mxu1  ;;  %v511_v27 = vadd.f32 %v489_v8, %v418_v14  ;;  %v1890_v8 = vsel %vm93_vm0, %v1742_v22, %v200_v45 }
 0x280   :  { %v1555_v21 = vpop.f32.mrf.mxu0 }
 0x281   :  { %v1563_v15 = vpop.f32.mrf.mxu1  ;;  %v516_v31 = vadd.f32 %v1555_v21, %v499_v30 }
 0x282   :  { %560 = vrot.lane.b32.xlu1 %v450_v10, %s1681_s1  ;;  %530 = vrot.lane.b32.xlu0 %v512_v13, %s1679_s29  ;;  %v431_v28 = vpop.f32.mrf.mxu0 }
 0x283   :  { %v463_v25 = vpop.f32.mrf.mxu1  ;;  %v514_v39 = vadd.f32 %v495_v17, %v431_v28  ;;  %v601_v17 = vrot.slane %v1730_v9, %v600_v2 }
 0x284   :  { %v1556_v32 = vpop.f32.mrf.mxu0 }
 0x285   :  { %v1564_v29 = vpop.f32.mrf.mxu1  ;;  %v517_v42 = vadd.f32 %v1556_v32, %v501_v38 }
 0x286   :  { %526 = vrot.lane.b32.xlu0 %v510_v18, %s1679_s29  ;;  %532 = vrot.lane.b32.xlu1 %v513_v19, %s1679_s29  ;;  %v434_v43 = vpop.f32.mrf.mxu0 }
 0x287   :  { %v466_v33 = vpop.f32.mrf.mxu1  ;;  %v515_v44 = vadd.f32 %v497_v26, %v434_v43 }
 0x28a   :  { %566 = vrot.lane.b32.xlu0 %v463_v25, %s1681_s1  ;;  %528 = vrot.lane.b32.xlu1 %v511_v27, %s1679_s29 }
 0x28e   :  { %568 = vrot.lane.b32.xlu1 %v466_v33, %s1681_s1  ;;  %538 = vrot.lane.b32.xlu0 %v516_v31, %s1679_s29 }
 0x292   :  { %534 = vrot.lane.b32.xlu0 %v514_v39, %s1679_s29  ;;  %540 = vrot.lane.b32.xlu1 %v517_v42, %s1679_s29  ;;  %v1923_v42 = vsel %vm93_vm0, %v1760_v35, %v208_v49 }
 0x296   :  { %570 = vrot.lane.b32.xlu0 %v1563_v15, %s1681_s1  ;;  %536 = vrot.lane.b32.xlu1 %v515_v44, %s1679_s29 }
 0x29a   :  { %572 = vrot.lane.b32.xlu1 %v1564_v29, %s1681_s1 }
 0x2ec   :  { %v563_v53 = vpop.permute.xlu0 %562 }
 0x2f0   :  { %v559_v60 = vpop.permute.xlu0 %558  ;;  %v565_v61 = vpop.permute.xlu1 %564 }
 0x2f4   :  { %v561_v62 = vpop.permute.xlu1 %560  ;;  %v531_v63 = vpop.permute.xlu0 %530 }
 0x2f5   :  { %v584_v6 = vsel %vm93_vm0, %v531_v63, %v563_v53 }
 0x2f6   :  { %v592_v18 = vadd.f32 %v584_v6, %v1895_v11 }
 0x2f8   :  { %v527_v0 = vpop.permute.xlu0 %526  ;;  %v533_v1 = vpop.permute.xlu1 %532  ;;  %v1912_v30 = vadd.f32 %v601_v17, %v592_v18 }
 0x2f9   :  { %v582_v3 = vsel %vm93_vm0, %v527_v0, %v559_v60  ;;  %v585_v4 = vsel %vm93_vm0, %v533_v1, %v565_v61  ;;  %v1935_v60 = vsel %vm93_vm0, %v1764_v37, %v212_v51 }
 0x2fa   :  { %v593_v10 = vadd.f32 %v585_v4, %v1885_v5  ;;  %v590_v13 = vadd.f32 %v582_v3, %v1890_v8 }
 0x2fc   :  { %v567_v14 = vpop.permute.xlu0 %566  ;;  %v529_v15 = vpop.permute.xlu1 %528  ;;  %v1906_v25 = vadd.f32 %v601_v17, %v593_v10  ;;  %v1908_v26 = vadd.f32 %v601_v17, %v590_v13 }
 0x2fd   :  { %v583_v19 = vsel %vm93_vm0, %v529_v15, %v561_v62 }
 0x2fe   :  { %v591_v21 = vadd.f32 %v583_v19, %v1900_v16  ;;  %v611_v32 = vpack.c.bf16 %v1906_v25, %v1912_v30 }
 0x300   :  { %v1910_v27 = vadd.f32 %v601_v17, %v591_v21  ;;  %v569_v28 = vpop.permute.xlu1 %568  ;;  %v539_v29 = vpop.permute.xlu0 %538 }
 0x302   :  { %v610_v31 = vpack.c.bf16 %v1910_v27, %v1908_v26 }
 0x304   :  { %1573 = vmatprep.mubr.msk.bf16.mxu1 %vm356_vm1, %v610_v31  ;;  %v535_v33 = vpop.permute.xlu0 %534  ;;  %v541_v38 = vpop.permute.xlu1 %540 }
 0x305   :  { %v586_v39 = vsel %vm93_vm0, %v535_v33, %v567_v14  ;;  %1574 = vmatmul.mubr.msk.bf16.vlgmr.msra.gmra.mxu1 %vm356_vm1, %v611_v32 }
 0x306   :  { %v594_v43 = vadd.f32 %v586_v39, %v1923_v42 }
 0x308   :  { %v571_v44 = vpop.permute.xlu0 %570  ;;  %v537_v45 = vpop.permute.xlu1 %536  ;;  %v1937_v49 = vadd.f32 %v601_v17, %v594_v43 }
 0x309   :  { %v588_v47 = vsel %vm93_vm0, %v539_v29, %v571_v44  ;;  %v587_v48 = vsel %vm93_vm0, %v537_v45, %v569_v28  ;;  %v1676_v44 = vld [vmem:[%s2269_s2 + $0x40] sm:$0xff]  }
 0x30a   :  { %v595_v53 = vadd.f32 %v587_v48, %v1928_v46  ;;  %v596_v61 = vadd.f32 %v588_v47, %v1935_v60  ;;  %v1677_v48 = vld [vmem:[%s2269_s2 + $0x38] sm:$0xff]  }
 0x30c   :  { %v1940_v62 = vadd.f32 %v601_v17, %v595_v53  ;;  %v573_v63 = vpop.permute.xlu1 %572  ;;  %v1950_v51 = vadd.f32 %v601_v17, %v596_v61 }
 0x30d   :  { %v589_v0 = vsel %vm93_vm0, %v541_v38, %v573_v63  ;;  %v1675_v38 = vld [vmem:[%s2269_s2 + $0x48] sm:$0xff]   ;;  %v1678_v63 = vld [vmem:[%s2269_s2 + $0x30] sm:$0xff]   ;;  %s1682_s2 = smov 97  }
 0x30e   :  { %v597_v1 = vadd.f32 %v589_v0, %v1944_v50  ;;  %v612_v2 = vpack.c.bf16 %v1940_v62, %v1937_v49  ;;  %1605 = vmatprep.subr.bf16.mxu0 %v1675_v38 }
 0x30f   :  { %1606 = vmatpush3.bf16.msra.mxu0 %v1675_v38 }
 0x310   :  { %v1952_v3 = vadd.f32 %v601_v17, %v597_v1  ;;  %1577 = vmatprep.mubr.msk.bf16.mxu1 %vm356_vm1, %v612_v2  ;;  %1607 = vmatprep.subr.bf16.mxu0 %v1676_v44 }
 0x312   :  { %v613_v4 = vpack.c.bf16 %v1952_v3, %v1950_v51 }
 0x313   :  { %1608 = vmatpush3.bf16.msra.mxu0 %v1676_v44 }
 0x314   :  { %1578 = vmatmul.mubr.msk.bf16.gmra.mxu1 %vm356_vm1, %v613_v4  ;;  %1609 = vmatprep.subr.bf16.mxu0 %v1677_v48 }
 0x315   :  { %1589 = vmatprep.mubr.msk.bf16.mxu1 %vm356_vm1, %v1775_v40 }
 0x317   :  { %1610 = vmatpush3.bf16.msra.mxu0 %v1677_v48 }
 0x318   :  { %1611 = vmatprep.subr.bf16.mxu0 %v1678_v63 }
 0x31b   :  { %1612 = vmatpush3.bf16.msra.mxu0 %v1678_v63  ;;  %v906_v63 = vsub.s32 2, %v1725_v7 }
 0x3c5   :  { %v1960_v52 = vpop.f32.mrf.mxu1 }
 0x3c6   :  { %2281 = vst [vmem:[#allocation2_spill] sm:$0xff] %v1960_v52  ;;  %828 = vrot.lane.b32.xlu0 %v1960_v52, %s1679_s29 }
 0x3c7   :  { %v1964_v6 = vpop.f32.mrf.mxu1 }
 0x3c8   :  { %2282 = vst [vmem:[#allocation3_spill] sm:$0xff] %v1964_v6 }
 0x3c9   :  { %v1966_v10 = vpop.f32.mrf.mxu1 }
 0x3ca   :  { %2283 = vst [vmem:[#allocation4_spill] sm:$0xff] %v1966_v10  ;;  %824 = vrot.lane.b32.xlu0 %v1964_v6, %s1679_s29  ;;  %830 = vrot.lane.b32.xlu1 %v1966_v10, %s1679_s29  ;;  %v716_v28 = vpack.c.bf16 %v1966_v10, %v1960_v52 }
 0x3cb   :  { %v1972_v13 = vpop.f32.mrf.mxu1 }
 0x3cc   :  { %2284 = vst [vmem:[#allocation5_spill] sm:$0xff] %v1972_v13  ;;  %v715_v29 = vpack.c.bf16 %v1972_v13, %v1964_v6 }
 0x3ce   :  { %826 = vrot.lane.b32.xlu1 %v1972_v13, %s1679_s29 }
 0x3d4   :  { %v1976_v14 = vpop.f32.mrf.mxu1 }
 0x3d5   :  { %2285 = vst [vmem:[#allocation6_spill] sm:$0xff] %v1976_v14 }
 0x3d6   :  { %v1978_v15 = vpop.f32.mrf.mxu1 }
 0x3d7   :  { %2286 = vst [vmem:[#allocation7_spill] sm:$0xff] %v1978_v15  ;;  %832 = vrot.lane.b32.xlu0 %v1978_v15, %s1679_s29 }
 0x3d8   :  { %v1982_v17 = vpop.f32.mrf.mxu1 }
 0x3d9   :  { %2287 = vst [vmem:[#allocation8_spill] sm:$0xff] %v1982_v17  ;;  %v718_v18 = vpack.c.bf16 %v1982_v17, %v1976_v14 }
 0x3da   :  { %v1986_v19 = vpop.f32.mrf.mxu1 }
 0x3db   :  { %2288 = vst [vmem:[#allocation9_spill] sm:$0xff] %v1986_v19  ;;  %v717_v21 = vpack.c.bf16 %v1986_v19, %v1978_v15  ;;  %1581 = vmatprep.subr.bf16.mxu1 %v718_v18  ;;  %834 = vrot.lane.b32.xlu1 %v1986_v19, %s1679_s29 }
 0x3dc   :  { %1582 = vmatpush3.bf16.msra.mxu1 %v718_v18 }
 0x3dd   :  { %1583 = vmatprep.subr.bf16.mxu1 %v717_v21 }
 0x3e0   :  { %1584 = vmatpush3.bf16.msra.mxu1 %v717_v21 }
 0x3e1   :  { %1585 = vmatprep.subr.bf16.mxu1 %v716_v28 }
 0x3e4   :  { %1586 = vmatpush3.bf16.msra.mxu1 %v716_v28 }
 0x3e5   :  { %1587 = vmatprep.subr.bf16.mxu1 %v715_v29 }
 0x3e8   :  { %1588 = vmatpush3.bf16.msra.mxu1 %v715_v29 }
 0x3eb   :  { %1590 = vmatmul.mubr.msk.bf16.vlgmr.msra.gmra.mxu1 %vm356_vm1, %v1807_v54 }
 0x3ec   :  { %1593 = vmatprep.mubr.msk.bf16.mxu1 %vm356_vm1, %v1817_v56 }
 0x3f3   :  { %1594 = vmatmul.mubr.msk.bf16.gmra.mxu1 %vm356_vm1, %v1841_v58 }
 0x3f4   :  { %1597 = vmatprep.mubr.msk.bf16.mxu1 %vm356_vm1, %v1780_v41 }
 0x3fb   :  { %1598 = vmatmul.mubr.msk.bf16.gmra.mxu1 %vm356_vm1, %v1812_v55 }
 0x3fc   :  { %1601 = vmatprep.mubr.msk.bf16.mxu1 %vm356_vm1, %v1822_v57 }
 0x403   :  { %1602 = vmatmul.mubr.msk.bf16.gmra.mxu1 %vm356_vm1, %v1846_v59 }
 0x438   :  { %v829_v29 = vpop.permute.xlu0 %828 }
 0x43c   :  { %v831_v38 = vpop.permute.xlu1 %830  ;;  %v825_v44 = vpop.permute.xlu0 %824 }
 0x440   :  { %v827_v48 = vpop.permute.xlu1 %826 }
 0x4ab   :  { %v1591_v31 = vpop.f32.mrf.mxu1 }
 0x4ad   :  { %v753_v32 = vpop.f32.mrf.mxu1 }
 0x4af   :  { %v1592_v33 = vpop.f32.mrf.mxu1 }
 0x4b1   :  { %v756_v39 = vpop.f32.mrf.mxu1 }
 0x4b3   :  { %v2013_v43 = vpop.f32.mrf.mxu1 }
 0x4b5   :  { %v769_v45 = vpop.f32.mrf.mxu1 }
 0x4b7   :  { %v2018_v47 = vpop.f32.mrf.mxu1 }
 0x4b9   :  { %v2023_v53 = vpop.f32.mrf.mxu1 }
 0x4bb   :  { %v1599_v61 = vpop.f32.mrf.mxu1 }
 0x4bc   :  { %868 = vrot.lane.b32.xlu0 %v1599_v61, %s1679_s29  ;;  %v833_v61 = vpop.permute.xlu0 %832 }
 0x4bd   :  { %v785_v0 = vpop.f32.mrf.mxu1 }
 0x4bf   :  { %v1600_v1 = vpop.f32.mrf.mxu1 }
 0x4c0   :  { %864 = vrot.lane.b32.xlu0 %v785_v0, %s1679_s29  ;;  %870 = vrot.lane.b32.xlu1 %v1600_v1, %s1679_s29  ;;  %v850_v0 = vadd.f32 %v1591_v31, %v829_v29  ;;  %v835_v1 = vpop.permute.xlu1 %834  ;;  %v849_v29 = vadd.f32 %v827_v48, %v756_v39 }
 0x4c1   :  { %v788_v2 = vpop.f32.mrf.mxu1 }
 0x4c3   :  { %v1603_v4 = vpop.f32.mrf.mxu1 }
 0x4c4   :  { %836 = vrot.lane.b32.xlu0 %v1976_v14, %s1679_s29  ;;  %866 = vrot.lane.b32.xlu1 %v788_v2, %s1679_s29 }
 0x4c5   :  { %v801_v18 = vpop.f32.mrf.mxu1 }
 0x4c7   :  { %v1604_v21 = vpop.f32.mrf.mxu1 }
 0x4c8   :  { %838 = vrot.lane.b32.xlu1 %v1982_v17, %s1679_s29  ;;  %872 = vrot.lane.b32.xlu0 %v801_v18, %s1679_s29  ;;  %v907_v18 = vrot.slane %v1730_v9, %v906_v63  ;;  %v848_v17 = vadd.f32 %v825_v44, %v753_v32 }
 0x4c9   :  { %v804_v28 = vpop.f32.mrf.mxu1 }
 0x4cc   :  { %876 = vrot.lane.b32.xlu0 %v1603_v4, %s1679_s29  ;;  %874 = vrot.lane.b32.xlu1 %v804_v28, %s1679_s29  ;;  %v851_v28 = vadd.f32 %v1592_v33, %v831_v38 }
 0x4d0   :  { %878 = vrot.lane.b32.xlu1 %v1604_v21, %s1679_s29 }
 0x52e   :  { %v869_v2 = vpop.permute.xlu0 %868 }
 0x52f   :  { %v890_v14 = vsel %vm93_vm0, %v850_v0, %v869_v2 }
 0x530   :  { %v898_v4 = vadd.f32 %v890_v14, %v1895_v11 }
 0x532   :  { %v865_v15 = vpop.permute.xlu0 %864  ;;  %v871_v21 = vpop.permute.xlu1 %870  ;;  %v910_v10 = vadd.f32 %v907_v18, %v898_v4 }
 0x533   :  { %v888_v19 = vsel %vm93_vm0, %v848_v17, %v865_v15  ;;  %v891_v13 = vsel %vm93_vm0, %v851_v28, %v871_v21  ;;  %v852_v17 = vadd.f32 %v833_v61, %v769_v45 }
 0x534   :  { %v896_v52 = vadd.f32 %v888_v19, %v1890_v8  ;;  %v899_v31 = vadd.f32 %v891_v13, %v1885_v5  ;;  %v918_v14 = vadd.f32 %v910_v10, %v1912_v30  ;;  %v853_v10 = vadd.f32 %v835_v1, %v2023_v53 }
 0x536   :  { %v911_v6 = vadd.f32 %v907_v18, %v899_v31  ;;  %v837_v0 = vpop.permute.xlu0 %836  ;;  %v867_v2 = vpop.permute.xlu1 %866  ;;  %v908_v32 = vadd.f32 %v907_v18, %v896_v52 }
 0x537   :  { %v889_v63 = vsel %vm93_vm0, %v849_v29, %v867_v2  ;;  %v854_v52 = vadd.f32 %v2013_v43, %v837_v0 }
 0x538   :  { %v919_v33 = vadd.f32 %v911_v6, %v1906_v25  ;;  %v897_v15 = vadd.f32 %v889_v63, %v1900_v16  ;;  %v916_v39 = vadd.f32 %v908_v32, %v1908_v26 }
 0x53a   :  { %v925_v38 = vpack.c.bf16 %v919_v33, %v918_v14  ;;  %v909_v44 = vadd.f32 %v907_v18, %v897_v15  ;;  %v873_v4 = vpop.permute.xlu0 %872  ;;  %v839_v19 = vpop.permute.xlu1 %838 }
 0x53b   :  { %v892_v13 = vsel %vm93_vm0, %v852_v17, %v873_v4  ;;  %v855_v14 = vadd.f32 %v2018_v47, %v839_v19 }
 0x53c   :  { %v917_v48 = vadd.f32 %v909_v44, %v1910_v27  ;;  %v900_v28 = vadd.f32 %v892_v13, %v1923_v42 }
 0x53e   :  { %v877_v6 = vpop.permute.xlu0 %876  ;;  %v875_v21 = vpop.permute.xlu1 %874  ;;  %v924_v31 = vpack.c.bf16 %v917_v48, %v916_v39  ;;  %v912_v29 = vadd.f32 %v907_v18, %v900_v28 }
 0x53f   :  { %v894_v45 = vsel %vm93_vm0, %v854_v52, %v877_v6  ;;  %v893_v61 = vsel %vm93_vm0, %v853_v10, %v875_v21 }
 0x540   :  { %v902_v2 = vadd.f32 %v894_v45, %v1935_v60  ;;  %v901_v63 = vadd.f32 %v893_v61, %v1928_v46  ;;  %1613 = vmatprep.mubr.msk.bf16.mxu0 %vm356_vm1, %v924_v31  ;;  %v920_v0 = vadd.f32 %v912_v29, %v1937_v49 }
 0x541   :  { %1614 = vmatmul.mubr.msk.bf16.vlgmr.msra.gmra.mxu0 %vm356_vm1, %v925_v38 }
 0x542   :  { %v913_v53 = vadd.f32 %v907_v18, %v901_v63  ;;  %v879_v43 = vpop.permute.xlu1 %878  ;;  %v914_v32 = vadd.f32 %v907_v18, %v902_v2 }
 0x543   :  { %v895_v1 = vsel %vm93_vm0, %v855_v14, %v879_v43 }
 0x544   :  { %v921_v33 = vadd.f32 %v913_v53, %v1940_v62  ;;  %v903_v15 = vadd.f32 %v895_v1, %v1944_v50  ;;  %v922_v4 = vadd.f32 %v914_v32, %v1950_v51 }
 0x546   :  { %v915_v17 = vadd.f32 %v907_v18, %v903_v15  ;;  %v926_v44 = vpack.c.bf16 %v921_v33, %v920_v0  ;;  %v1240_v0 = vsub.s32 4, %v1725_v7 }
 0x548   :  { %v923_v13 = vadd.f32 %v915_v17, %v1952_v3  ;;  %1617 = vmatprep.mubr.msk.bf16.mxu0 %vm356_vm1, %v926_v44  ;;  %v1241_v32 = vrot.slane %v1730_v9, %v1240_v0 }
 0x54a   :  { %v927_v47 = vpack.c.bf16 %v923_v13, %v922_v4  ;;  %v1242_v33 = vmul.f32 %v1241_v32, %v1742_v22  ;;  %v1244_v17 = vmul.f32 %v1241_v32, %v1746_v24  ;;  %v1245_v4 = vmul.f32 %v1241_v32, %v1740_v20 }
 0x54b   :  { %v1243_v13 = vmul.f32 %v1241_v32, %v1744_v23  ;;  %v1246_v22 = vmul.f32 %v1241_v32, %v1760_v35 }
 0x54c   :  { %1618 = vmatmul.mubr.msk.bf16.gmra.mxu0 %vm356_vm1, %v927_v47  ;;  %v1250_v15 = vsel %vm93_vm0, %v1242_v33, 0.0  ;;  %v1256_v44 = vsel %vm93_vm0, %v1244_v17, 0.0  ;;  %v1259_v47 = vsel %vm93_vm0, %v1245_v4, 0.0 }
 0x54d   :  { %1629 = vmatprep.mubr.msk.bf16.mxu0 %vm356_vm1, %v1775_v40  ;;  %v1262_v20 = vsel %vm93_vm0, %v1246_v22, 0.0 }
 0x601   :  { %v2075_v38 = vpop.f32.mrf.mxu0 }
 0x602   :  { %1142 = vrot.lane.b32.xlu0 %v2075_v38, %s1679_s29 }
 0x603   :  { %v2079_v19 = vpop.f32.mrf.mxu0 }
 0x605   :  { %v2081_v18 = vpop.f32.mrf.mxu0 }
 0x606   :  { %1138 = vrot.lane.b32.xlu0 %v2079_v19, %s1679_s29  ;;  %1144 = vrot.lane.b32.xlu1 %v2081_v18, %s1679_s29  ;;  %v1030_v21 = vpack.c.bf16 %v2081_v18, %v2075_v38 }
 0x607   :  { %v2087_v39 = vpop.f32.mrf.mxu0 }
 0x608   :  { %v1029_v31 = vpack.c.bf16 %v2087_v39, %v2079_v19 }
 0x60a   :  { %1140 = vrot.lane.b32.xlu1 %v2087_v39, %s1679_s29 }
 0x60c   :  { %v2091_v40 = vpop.f32.mrf.mxu0 }
 0x60d   :  { %1150 = vrot.lane.b32.xlu0 %v2091_v40, %s1679_s29 }
 0x60e   :  { %v2095_v48 = vpop.f32.mrf.mxu0 }
 0x610   :  { %v2097_v28 = vpop.f32.mrf.mxu0 }
 0x611   :  { %v1032_v10 = vpack.c.bf16 %v2097_v28, %v2091_v40  ;;  %1146 = vrot.lane.b32.xlu0 %v2095_v48, %s1679_s29  ;;  %1152 = vrot.lane.b32.xlu1 %v2097_v28, %s1679_s29 }
 0x612   :  { %v2105_v52 = vpop.f32.mrf.mxu0 }
 0x613   :  { %v1031_v6 = vpack.c.bf16 %v2105_v52, %v2095_v48  ;;  %1621 = vmatprep.subr.bf16.mxu0 %v1032_v10 }
 0x614   :  { %1622 = vmatpush3.bf16.msra.mxu0 %v1032_v10  ;;  %v1247_v10 = vmul.f32 %v1241_v32, %v1762_v36 }
 0x615   :  { %1148 = vrot.lane.b32.xlu1 %v2105_v52, %s1679_s29  ;;  %1623 = vmatprep.subr.bf16.mxu0 %v1031_v6 }
 0x616   :  { %v1265_v24 = vsel %vm93_vm0, %v1247_v10, 0.0 }
 0x618   :  { %1624 = vmatpush3.bf16.msra.mxu0 %v1031_v6  ;;  %v1253_v6 = vsel %vm93_vm0, %v1243_v13, 0.0 }
 0x619   :  { %1625 = vmatprep.subr.bf16.mxu0 %v1030_v21 }
 0x61c   :  { %1626 = vmatpush3.bf16.msra.mxu0 %v1030_v21  ;;  %v1249_v21 = vmul.f32 %v1241_v32, %v1758_v34  ;;  %v1220_v34 = vsub.s32 3, %v1725_v7 }
 0x61d   :  { %1627 = vmatprep.subr.bf16.mxu0 %v1029_v31 }
 0x61e   :  { %v1271_v23 = vsel %vm93_vm0, %v1249_v21, 0.0 }
 0x620   :  { %1628 = vmatpush3.bf16.msra.mxu0 %v1029_v31  ;;  %v1248_v31 = vmul.f32 %v1241_v32, %v1764_v37  ;;  %v1221_v37 = vrot.slane %v1730_v9, %v1220_v34  ;;  %v1292_v32 = vsub.s32 5, %v1725_v7 }
 0x622   :  { %v1268_v36 = vsel %vm93_vm0, %v1248_v31, 0.0  ;;  %v1293_v10 = vrot.slane %v1730_v9, %v1292_v32 }
 0x623   :  { %1630 = vmatmul.mubr.msk.bf16.vlgmr.msra.gmra.mxu0 %vm356_vm1, %v1807_v54 }
 0x624   :  { %1633 = vmatprep.mubr.msk.bf16.mxu0 %vm356_vm1, %v1817_v56 }
 0x62b   :  { %1634 = vmatmul.mubr.msk.bf16.gmra.mxu0 %vm356_vm1, %v1841_v58 }
 0x62c   :  { %1637 = vmatprep.mubr.msk.bf16.mxu0 %vm356_vm1, %v1780_v41 }
 0x633   :  { %1638 = vmatmul.mubr.msk.bf16.gmra.mxu0 %vm356_vm1, %v1812_v55 }
 0x634   :  { %1641 = vmatprep.mubr.msk.bf16.mxu0 %vm356_vm1, %v1822_v57 }
 0x63b   :  { %1642 = vmatmul.mubr.msk.bf16.gmra.mxu0 %vm356_vm1, %v1846_v59 }
 0x6e3   :  { %v1631_v45 = vpop.f32.mrf.mxu0 }
 0x6e5   :  { %v2129_v54 = vpop.f32.mrf.mxu0 }
 0x6e7   :  { %v2131_v61 = vpop.f32.mrf.mxu0 }
 0x6e9   :  { %v2133_v56 = vpop.f32.mrf.mxu0 }
 0x6eb   :  { %v2135_v58 = vpop.f32.mrf.mxu0 }
 0x6ed   :  { %v2137_v29 = vpop.f32.mrf.mxu0 }
 0x6ef   :  { %v2139_v41 = vpop.f32.mrf.mxu0 }
 0x6f1   :  { %v2141_v55 = vpop.f32.mrf.mxu0 }
 0x6f3   :  { %v1639_v2 = vpop.f32.mrf.mxu0 }
 0x6f4   :  { %1182 = vrot.lane.b32.xlu0 %v1639_v2, %s1679_s29  ;;  %v1143_v2 = vpop.permute.xlu0 %1142 }
 0x6f5   :  { %v1099_v57 = vpop.f32.mrf.mxu0 }
 0x6f7   :  { %v1640_v59 = vpop.f32.mrf.mxu0 }
 0x6f8   :  { %1178 = vrot.lane.b32.xlu0 %v1099_v57, %s1679_s29  ;;  %1184 = vrot.lane.b32.xlu1 %v1640_v59, %s1679_s29  ;;  %v1145_v57 = vpop.permute.xlu1 %1144  ;;  %v1139_v35 = vpop.permute.xlu0 %1138 }
 0x6f9   :  { %v1102_v63 = vpop.f32.mrf.mxu0  ;;  %v1162_v17 = vadd.f32 %v1139_v35, %v2129_v54 }
 0x6fb   :  { %v1643_v14 = vpop.f32.mrf.mxu0 }
 0x6fc   :  { %1180 = vrot.lane.b32.xlu1 %v1102_v63, %s1679_s29  ;;  %v1141_v59 = vpop.permute.xlu1 %1140  ;;  %v1151_v63 = vpop.permute.xlu0 %1150 }
 0x6fd   :  { %v1115_v53 = vpop.f32.mrf.mxu0 }
 0x6fe   :  { %1186 = vrot.lane.b32.xlu0 %v1115_v53, %s1679_s29 }
 0x6ff   :  { %v1644_v43 = vpop.f32.mrf.mxu0 }
 0x700   :  { %v1147_v53 = vpop.permute.xlu0 %1146 }
 0x701   :  { %v1118_v1 = vpop.f32.mrf.mxu0  ;;  %v1166_v31 = vadd.f32 %v1147_v53, %v2137_v29  ;;  %v1168_v29 = vadd.f32 %v2135_v58, %v1151_v63 }
 0x702   :  { %1190 = vrot.lane.b32.xlu0 %v1643_v14, %s1679_s29  ;;  %1188 = vrot.lane.b32.xlu1 %v1118_v1, %s1679_s29  ;;  %v1153_v14 = vpop.permute.xlu1 %1152 }
 0x703   :  { %v1169_v63 = vadd.f32 %v2139_v41, %v1153_v14 }
 0x706   :  { %1192 = vrot.lane.b32.xlu1 %v1644_v43, %s1679_s29  ;;  %v1164_v43 = vadd.f32 %v1631_v45, %v1143_v2  ;;  %v1149_v1 = vpop.permute.xlu1 %1148 }
 0x707   :  { %v1167_v53 = vadd.f32 %v1149_v1, %v2141_v55 }
 0x721   :  { %1251 = vadd.xlane.f32.xlu0 %v1250_v15 }
 0x725   :  { %1257 = vadd.xlane.f32.xlu0 %v1256_v44  ;;  %v1165_v44 = vadd.f32 %v2131_v61, %v1145_v57 }
 0x729   :  { %1260 = vadd.xlane.f32.xlu0 %v1259_v47 }
 0x72a   :  { %1254 = vadd.xlane.f32.xlu1 %v1253_v6 }
 0x72d   :  { %1266 = vadd.xlane.f32.xlu0 %v1265_v24 }
 0x72e   :  { %1263 = vadd.xlane.f32.xlu1 %v1262_v20 }
 0x731   :  { %1272 = vadd.xlane.f32.xlu0 %v1271_v23 }
 0x732   :  { %1269 = vadd.xlane.f32.xlu1 %v1268_v36 }
 0x766   :  { %v1183_v0 = vpop.permute.xlu0 %1182 }
 0x767   :  { %v1204_v33 = vsel %vm93_vm0, %v1164_v43, %v1183_v0 }
 0x768   :  { %v1212_v15 = vadd.f32 %v1204_v33, %v1895_v11  ;;  %v1163_v11 = vadd.f32 %v1141_v59, %v2133_v56 }
 0x76a   :  { %v1224_v4 = vadd.f32 %v1221_v37, %v1212_v15  ;;  %v1179_v13 = vpop.permute.xlu0 %1178  ;;  %v1185_v47 = vpop.permute.xlu1 %1184 }
 0x76b   :  { %v1202_v45 = vsel %vm93_vm0, %v1162_v17, %v1179_v13  ;;  %v1205_v6 = vsel %vm93_vm0, %v1165_v44, %v1185_v47 }
 0x76c   :  { %v1210_v22 = vadd.f32 %v1202_v45, %v1890_v8  ;;  %v1213_v7 = vadd.f32 %v1205_v6, %v1885_v5  ;;  %v1232_v24 = vadd.f32 %v1224_v4, %v1912_v30 }
 0x76e   :  { %v1222_v54 = vadd.f32 %v1221_v37, %v1210_v22  ;;  %v1225_v21 = vadd.f32 %v1221_v37, %v1213_v7  ;;  %v1181_v61 = vpop.permute.xlu1 %1180  ;;  %v1296_v20 = vmul.f32 %v1293_v10, %v1232_v24 }
 0x76f   :  { %v1203_v9 = vsel %vm93_vm0, %v1163_v11, %v1181_v61 }
 0x770   :  { %v1211_v23 = vadd.f32 %v1203_v9, %v1900_v16  ;;  %v1187_v36 = vpop.permute.xlu0 %1186  ;;  %v1308_v2 = vsel %vm356_vm1, %v1296_v20, 0.0  ;;  %v1230_v8 = vadd.f32 %v1222_v54, %v1908_v26  ;;  %v1233_v5 = vadd.f32 %v1225_v21, %v1906_v25 }
 0x771   :  { %v1206_v30 = vsel %vm93_vm0, %v1166_v31, %v1187_v36  ;;  %1309 = vadd.xlane.f32.xlu1 %v1308_v2  ;;  %v2290_v2 = vld [vmem:[#allocation2_spill] sm:$0xff] }
 0x772   :  { %v1223_v56 = vadd.f32 %v1221_v37, %v1211_v23  ;;  %v1214_v57 = vadd.f32 %v1206_v30, %v1923_v42  ;;  %v1294_v35 = vmul.f32 %v1293_v10, %v1230_v8  ;;  %v1297_v59 = vmul.f32 %v1293_v10, %v1233_v5  ;;  %v2289_v23 = vld [vmem:[#allocation3_spill] sm:$0xff]  ;;  %v2291_v30 = vld [vmem:[#allocation4_spill] sm:$0xff] }
 0x774   :  { %v1191_v16 = vpop.permute.xlu0 %1190  ;;  %v1189_v34 = vpop.permute.xlu1 %1188  ;;  %v1302_v43 = vsel %vm356_vm1, %v1294_v35, 0.0  ;;  %v1311_v26 = vsel %vm356_vm1, %v1297_v59, 0.0  ;;  %v1231_v25 = vadd.f32 %v1223_v56, %v1910_v27  ;;  %v1226_v42 = vadd.f32 %v1221_v37, %v1214_v57 }
 0x775   :  { %v1208_v0 = vsel %vm93_vm0, %v1168_v29, %v1191_v16  ;;  %v1207_v32 = vsel %vm93_vm0, %v1167_v53, %v1189_v34  ;;  %1303 = vadd.xlane.f32.xlu1 %v1302_v43  ;;  %1312 = vadd.xlane.f32.xlu0 %v1311_v26  ;;  %v2293_v34 = vld [vmem:[#allocation9_spill] sm:$0xff]  ;;  %v2294_v26 = vld [vmem:[#allocation7_spill] sm:$0xff] }
 0x776   :  { %v1216_v33 = vadd.f32 %v1208_v0, %v1935_v60  ;;  %v1215_v58 = vadd.f32 %v1207_v32, %v1928_v46  ;;  %v1295_v55 = vmul.f32 %v1293_v10, %v1231_v25  ;;  %v1234_v60 = vadd.f32 %v1226_v42, %v1937_v49 }
 0x778   :  { %v1228_v1 = vadd.f32 %v1221_v37, %v1216_v33  ;;  %v1227_v15 = vadd.f32 %v1221_v37, %v1215_v58  ;;  %v1193_v17 = vpop.permute.xlu1 %1192  ;;  %v1305_v44 = vsel %vm356_vm1, %v1295_v55, 0.0  ;;  %v1298_v22 = vmul.f32 %v1293_v10, %v1234_v60 }
 0x779   :  { %v1209_v27 = vsel %vm93_vm0, %v1169_v63, %v1193_v17  ;;  %1306 = vadd.xlane.f32.xlu0 %v1305_v44  ;;  %v2296_v44 = vld [vmem:[#allocation6_spill] sm:$0xff] }
 0x77a   :  { %v1217_v4 = vadd.f32 %v1209_v27, %v1944_v50  ;;  %v1236_v13 = vadd.f32 %v1228_v1, %v1950_v51  ;;  %v1235_v47 = vadd.f32 %v1227_v15, %v1940_v62  ;;  %v1314_v50 = vsel %vm356_vm1, %v1298_v22, 0.0  ;;  %v2295_v15 = vld [vmem:[#allocation8_spill] sm:$0xff] }
 0x77c   :  { %v1229_v46 = vadd.f32 %v1221_v37, %v1217_v4  ;;  %v1300_v45 = vmul.f32 %v1293_v10, %v1236_v13  ;;  %v1299_v6 = vmul.f32 %v1293_v10, %v1235_v47 }
 0x77e   :  { %v1320_v41 = vsel %vm356_vm1, %v1300_v45, 0.0  ;;  %v1317_v14 = vsel %vm356_vm1, %v1299_v6, 0.0  ;;  %v1237_v7 = vadd.f32 %v1229_v46, %v1952_v3 }
 0x77f   :  { %1321 = vadd.xlane.f32.xlu1 %v1320_v41  ;;  %1318 = vadd.xlane.f32.xlu0 %v1317_v14 }
 0x780   :  { %v1301_v24 = vmul.f32 %v1293_v10, %v1237_v7 }
 0x782   :  { %v1323_v51 = vsel %vm356_vm1, %v1301_v24, 0.0 }
 0x783   :  { %1315 = vadd.xlane.f32.xlu1 %v1314_v50  ;;  %1324 = vadd.xlane.f32.xlu0 %v1323_v51 }
 0x794   :  { %1335 = vrot.lane.b32.xlu1 %v1734_v12, %s1682_s2  ;;  %v2292_v12 = vld [vmem:[#allocation5_spill] sm:$0xff] }
 0x7aa   :  { %v1252_v49 = vpop.xlane.xlu0 %1251 }
 0x7ab   :  { %v1274_v36 = vadd.f32 %v1252_v49, %v2289_v23 }
 0x7ad   :  { %v1282_v59 = vadd.f32 %v1274_v36, %v2079_v19 }
 0x7ae   :  { %v1258_v37 = vpop.xlane.xlu0 %1257 }
 0x7af   :  { %v1276_v8 = vadd.f32 %v2290_v2, %v1258_v37 }
 0x7b1   :  { %v1284_v35 = vadd.f32 %v2075_v38, %v1276_v8 }
 0x7b2   :  { %v1261_v54 = vpop.xlane.xlu0 %1260 }
 0x7b3   :  { %v1255_v62 = vpop.xlane.xlu1 %1254  ;;  %v1277_v56 = vadd.f32 %v2291_v30, %v1261_v54 }
 0x7b4   :  { %v1275_v57 = vadd.f32 %v1255_v62, %v2292_v12 }
 0x7b5   :  { %v1285_v32 = vadd.f32 %v2081_v18, %v1277_v56 }
 0x7b6   :  { %v1267_v61 = vpop.xlane.xlu0 %1266  ;;  %v1283_v42 = vadd.f32 %v1275_v57, %v2087_v39 }
 0x7b7   :  { %v1264_v11 = vpop.xlane.xlu1 %1263  ;;  %v1279_v43 = vadd.f32 %v1267_v61, %v2293_v34 }
 0x7b8   :  { %v1278_v25 = vadd.f32 %v1264_v11, %v2294_v26 }
 0x7b9   :  { %v1287_v38 = vadd.f32 %v1279_v43, %v2105_v52 }
 0x7ba   :  { %v1273_v20 = vpop.xlane.xlu0 %1272  ;;  %v1286_v19 = vadd.f32 %v1278_v25, %v2095_v48 }
 0x7bb   :  { %v1270_v21 = vpop.xlane.xlu1 %1269  ;;  %v1281_v17 = vadd.f32 %v2295_v15, %v1273_v20 }
 0x7bc   :  { %v1280_v27 = vadd.f32 %v2296_v44, %v1270_v21 }
 0x7bd   :  { %v1289_v46 = vadd.f32 %v2097_v28, %v1281_v17 }
 0x7be   :  { %v1288_v60 = vadd.f32 %v2091_v40, %v1280_v27 }
 0x7fa   :  { %v1310_v3 = vpop.xlane.xlu1 %1309 }
 0x7fb   :  { %v1328_v53 = vadd.f32 %v1310_v3, %v1284_v35 }
 0x7fe   :  { %v1304_v31 = vpop.xlane.xlu1 %1303  ;;  %v1313_v10 = vpop.xlane.xlu0 %1312 }
 0x7ff   :  { %v1326_v16 = vadd.f32 %v1304_v31, %v1282_v59  ;;  %v1329_v63 = vadd.f32 %v1313_v10, %v1285_v32 }
 0x802   :  { %v1307_v29 = vpop.xlane.xlu0 %1306 }
 0x803   :  { %v1327_v1 = vadd.f32 %v1307_v29, %v1283_v42 }
 0x808   :  { %v1322_v9 = vpop.xlane.xlu1 %1321  ;;  %v1319_v55 = vpop.xlane.xlu0 %1318 }
 0x809   :  { %v1331_v39 = vadd.f32 %v1319_v55, %v1287_v38  ;;  %v1332_v48 = vadd.f32 %v1322_v9, %v1288_v60 }
 0x80c   :  { %v1316_v5 = vpop.xlane.xlu1 %1315  ;;  %v1325_v47 = vpop.xlane.xlu0 %1324 }
 0x80d   :  { %v1330_v13 = vadd.f32 %v1316_v5, %v1286_v19  ;;  %v1333_v6 = vadd.f32 %v1325_v47, %v1289_v46 }
 0x810   :  { %v1336_v0 = vpop.permute.xlu1 %1335 }
 0x811   :  { %v1340_v33 = vadd.f32 %v1336_v0, %v1328_v53  ;;  %v1338_v58 = vadd.f32 %v1336_v0, %v1326_v16  ;;  %v1339_v18 = vadd.f32 %v1336_v0, %v1327_v1  ;;  %v1341_v4 = vadd.f32 %v1336_v0, %v1329_v63 }
 0x812   :  { %v1342_v52 = vadd.f32 %v1336_v0, %v1330_v13  ;;  %v1343_v45 = vadd.f32 %v1336_v0, %v1331_v39  ;;  %v1344_v41 = vadd.f32 %v1336_v0, %v1332_v48  ;;  %v1345_v14 = vadd.f32 %v1336_v0, %v1333_v6 }
 0x813   :  { %1358 = vrot.lane.b32.xlu1 %v1340_v33, %s1680_s30  ;;  %1354 = vrot.lane.b32.xlu0 %v1338_v58, %s1680_s30 }
 0x817   :  { %1356 = vrot.lane.b32.xlu1 %v1339_v18, %s1680_s30  ;;  %1360 = vrot.lane.b32.xlu0 %v1341_v4, %s1680_s30 }
 0x81b   :  { %1362 = vrot.lane.b32.xlu1 %v1342_v52, %s1680_s30  ;;  %1364 = vrot.lane.b32.xlu0 %v1343_v45, %s1680_s30 }
 0x81f   :  { %1366 = vrot.lane.b32.xlu1 %v1344_v41, %s1680_s30  ;;  %1368 = vrot.lane.b32.xlu0 %v1345_v14, %s1680_s30 }
 0x885   :  { %v1359_v22 = vpop.permute.xlu1 %1358  ;;  %v1355_v7 = vpop.permute.xlu0 %1354 }
 0x886   :  { %1381 = vst.msk [vmem:[%s2272_s3 + $0x10] sm:$0xff] %vm1378_vm2, %v1359_v22  ;;  %1379 = vst.msk [vmem:[%s2272_s3] sm:$0xff] %vm1378_vm2, %v1355_v7 }
 0x889   :  { %v1357_v40 = vpop.permute.xlu1 %1356  ;;  %v1361_v28 = vpop.permute.xlu0 %1360 }
 0x88a   :  { %1380 = vst.msk [vmem:[%s2272_s3 + $0x8] sm:$0xff] %vm1378_vm2, %v1357_v40  ;;  %1382 = vst.msk [vmem:[%s2272_s3 + $0x18] sm:$0xff] %vm1378_vm2, %v1361_v28 }
 0x88d   :  { %v1363_v24 = vpop.permute.xlu1 %1362  ;;  %v1365_v50 = vpop.permute.xlu0 %1364 }
 0x88e   :  { %1383 = vst.msk [vmem:[%s2272_s3 + $0x20] sm:$0xff] %vm1378_vm2, %v1363_v24  ;;  %1384 = vst.msk [vmem:[%s2272_s3 + $0x28] sm:$0xff] %vm1378_vm2, %v1365_v50 }
 0x891   :  { %v1367_v51 = vpop.permute.xlu1 %1366  ;;  %v1369_v49 = vpop.permute.xlu0 %1368 }
 0x892   :  { %1385 = vst.msk [vmem:[%s2272_s3 + $0x30] sm:$0xff] %vm1378_vm2, %v1367_v51  ;;  %1386 = vst.msk [vmem:[%s2272_s3 + $0x38] sm:$0xff] %vm1378_vm2, %v1369_v49 }

</bundles_post_ra>
